<compile_context>
chip_gen: v5e
topology: v5e:2x2
jax: 0.10.0
libtpu: 0.0.40
codegen_flags: <defaults>
</compile_context>

<pallas_src>
import jax
import jax.numpy as jnp
from jax import lax
from jax.experimental import pallas as pl
from jax.experimental.pallas import tpu as pltpu

_EPS = 1e-5  # nn.LayerNorm default


def _expand_x4_kernel(x_ref, w_ref, seg_ref, segt_ref, g_ref, b_ref, o_ref):
    """One (batch, p1, row-tile) grid step.

    x_ref   : [1, TM, dim]          flattened input pixels of this row tile
    w_ref   : [1, dim, 4*dim]       expand-weight slice for this p1
    seg_ref : [4*dim, 4]            lane -> p2-group indicator (for LN stats)
    segt_ref: [4, 4*dim]            its transpose (group -> lanes broadcast)
    g_ref   : [1, 4*dim]            LayerNorm gamma, tiled over p2 groups
    b_ref   : [1, 4*dim]            LayerNorm beta,  tiled over p2 groups
    o_ref   : [1, TH, 1, W, 4*dim]  output slab indexed (b, h, p1, w, p2*dim+c)
    """
    dim = x_ref.shape[-1]

    x2d = x_ref[0].astype(jnp.float32)                      # [TM, dim]
    w = w_ref[0].astype(jnp.float32)                        # [dim, 4*dim]

    # Linear expansion: a single lane-dense MXU matmul.
    y = jnp.dot(x2d, w, preferred_element_type=jnp.float32)  # [TM, 4*dim]

    # Grouped LayerNorm over each dim-sized group of lanes (the p2 groups),
    # with no lane-crossing reshapes: stats via indicator matmuls.
    seg = seg_ref[...]                                       # [4*dim, 4]
    segt = segt_ref[...]                                     # [4, 4*dim]
    inv_dim = 1.0 / dim

    mean = jnp.dot(y, seg, preferred_element_type=jnp.float32) * inv_dim   # [TM, 4]
    yc = y - jnp.dot(mean, segt, preferred_element_type=jnp.float32)       # centered
    var = jnp.dot(yc * yc, seg, preferred_element_type=jnp.float32) * inv_dim
    rstd = lax.rsqrt(var + _EPS)                                           # [TM, 4]
    yn = yc * jnp.dot(rstd, segt, preferred_element_type=jnp.float32)

    out = yn * g_ref[...] + b_ref[...]                       # [TM, 4*dim]
    o_ref[...] = out.reshape(o_ref.shape).astype(o_ref.dtype)


def _pick_row_tile(H, W, lane_c, budget_bytes=4 << 20):
    """Largest divisor of H whose per-step f32 working set fits the budget."""
    M = H * W
    for th in range(H, 0, -1):
        if H % th:
            continue
        tm = th * W
        if tm % 8 != 0 and tm != M:      # (8,128) constraint on the x block
            continue
        if 8 * tm * lane_c * 4 <= budget_bytes:   # ~y/yc/yn + I/O buffers
            return th
    return H


def final_patch_expand_x4(x, w_expand, gamma, beta, *, dim_scale=4):
    """x: [B, H, W, dim]; w_expand: [16*dim, dim] (PyTorch Linear layout, no bias);
    gamma/beta: [dim].  Returns [B, 4H, 4W, dim]."""
    B, H, W, dim = x.shape
    P = dim_scale
    assert P == 4, "FinalPatchExpand_X4 uses dim_scale=4"
    assert w_expand.shape == (P * P * dim, dim)
    Lc = P * dim  # lane width of a per-p1 slab (=128 for dim=32: lane-dense)

    # Weight: [16*dim, dim] (out,in) -> per-p1 slices [P, dim, P*dim].  Tiny,
    # one-time, weights-only transform (no activation transpose passes).
    w_t = w_expand.T.reshape(dim, P, P * dim).transpose(1, 0, 2)

    # LayerNorm group-indicator matrices and tiled affine params.
    j = jnp.arange(Lc)
    seg = (j[:, None] // dim == jnp.arange(P)[None, :]).astype(jnp.float32)  # [Lc, P]
    segt = jnp.transpose(seg)                                                # [P, Lc]
    g_t = jnp.tile(gamma.astype(jnp.float32), P).reshape(1, Lc)
    b_t = jnp.tile(beta.astype(jnp.float32), P).reshape(1, Lc)

    # Free reshape: flatten pixels (no transpose).
    M = H * W
    x_flat = x.reshape(B, M, dim)

    TH = _pick_row_tile(H, W, Lc)
    HT = H // TH
    TM = TH * W

    out5 = pl.pallas_call(
        _expand_x4_kernel,
        out_shape=jax.ShapeDtypeStruct((B, H, P, W, Lc), x.dtype),
        grid_spec=pltpu.PrefetchScalarGridSpec(
            num_scalar_prefetch=0,
            grid=(B, P, HT),
            in_specs=[
                pl.BlockSpec((1, TM, dim), lambda b, p, t: (b, t, 0)),   # x tile
                pl.BlockSpec((1, dim, Lc), lambda b, p, t: (p, 0, 0)),   # weight slice
                pl.BlockSpec((Lc, P), lambda b, p, t: (0, 0)),           # seg
                pl.BlockSpec((P, Lc), lambda b, p, t: (0, 0)),           # seg^T
                pl.BlockSpec((1, Lc), lambda b, p, t: (0, 0)),           # gamma (tiled)
                pl.BlockSpec((1, Lc), lambda b, p, t: (0, 0)),           # beta (tiled)
            ],
            out_specs=pl.BlockSpec((1, TH, 1, W, Lc),
                                   lambda b, p, t: (b, t, p, 0, 0)),
        ),
        compiler_params=pltpu.CompilerParams(
            dimension_semantics=("parallel", "parallel", "parallel")),
    )(x_flat, w_t, seg, segt, g_t, b_t)

    # [B, H, p1, W, p2*dim+c] -> [B, 4H, 4W, dim] : pure reshape, zero data movement.
    return out5.reshape(B, H * P, W * P, dim)


def reference_forward(x, w_expand, gamma, beta, dim_scale=4, eps=_EPS):
    """Pure-JAX reference mirroring the PyTorch module."""
    B, H, W, dim = x.shape
    P = dim_scale
    y = jnp.einsum("bhwi,oi->bhwo", x, w_expand)                 # Linear, no bias
    y = (y.reshape(B, H, W, P, P, dim)
           .transpose(0, 1, 3, 2, 4, 5)
           .reshape(B, H * P, W * P, dim))                       # pixel-shuffle rearrange
    mean = jnp.mean(y, axis=-1, keepdims=True)
    var = jnp.mean((y - mean) ** 2, axis=-1, keepdims=True)
    return (y - mean) / jnp.sqrt(var + eps) * gamma + beta       # LayerNorm(dim)


if __name__ == "__main__":
    B, H, W, dim = 2, 8, 8, 32
    P = 4

    key = jax.random.PRNGKey(0)
    k1, k2, k3, k4 = jax.random.split(key, 4)

    x = jax.random.normal(k1, (B, H, W, dim), jnp.float32)
    # PyTorch nn.Linear(dim, 16*dim, bias=False) weight layout: [out, in]
    w_expand = 0.2 * jax.random.normal(k2, (P * P * dim, dim), jnp.float32)
    gamma = 1.0 + 0.1 * jax.random.normal(k3, (dim,), jnp.float32)
    beta = 0.1 * jax.random.normal(k4, (dim,), jnp.float32)

    out = final_patch_expand_x4(x, w_expand, gamma, beta)
    out = jax.block_until_ready(out)

    ref = reference_forward(x, w_expand, gamma, beta)
    assert out.shape == (B, P * H, P * W, dim), out.shape
    max_err = float(jnp.max(jnp.abs(out - ref)))
    assert jnp.allclose(out, ref, atol=1e-4, rtol=1e-4), max_err

    print("KERNEL_OK")
</pallas_src>

<mosaic_0001>
module attributes {stable_mosaic.version = 11 : i64} {
  func.func @_expand_x4_kernel(%arg0: i32, %arg1: i32, %arg2: i32, %arg3: memref<1x64x32xf32, #tpu.memory_space<vmem>>, %arg4: memref<1x32x128xf32, #tpu.memory_space<vmem>>, %arg5: memref<128x4xf32, #tpu.memory_space<vmem>>, %arg6: memref<4x128xf32, #tpu.memory_space<vmem>>, %arg7: memref<1x128xf32, #tpu.memory_space<vmem>>, %arg8: memref<1x128xf32, #tpu.memory_space<vmem>>, %arg9: memref<1x8x1x8x128xf32, #tpu.memory_space<vmem>>) attributes {dimension_semantics = [#tpu.dimension_semantics<parallel>, #tpu.dimension_semantics<parallel>, #tpu.dimension_semantics<parallel>], iteration_bounds = array<i64: 2, 4, 1>, scalar_prefetch = 0 : i64, scratch_operands = 0 : i64, tpu.core_type = #tpu.core_type<tc>, window_params = [{transform_indices = @transform_0, window_bounds = array<i64: 1, 64, 32>}, {transform_indices = @transform_1, window_bounds = array<i64: 1, 32, 128>}, {pipeline_mode = #tpu.pipeline_mode<synchronous>, transform_indices = @transform_2, window_bounds = array<i64: 128, 4>}, {pipeline_mode = #tpu.pipeline_mode<synchronous>, transform_indices = @transform_3, window_bounds = array<i64: 4, 128>}, {pipeline_mode = #tpu.pipeline_mode<synchronous>, transform_indices = @transform_4, window_bounds = array<i64: 1, 128>}, {pipeline_mode = #tpu.pipeline_mode<synchronous>, transform_indices = @transform_5, window_bounds = array<i64: 1, 128>}, {transform_indices = @transform_6, window_bounds = array<i64: 1, 8, 1, 8, 128>}]} {
    %c0 = arith.constant 0 : index
    %c0_0 = arith.constant 0 : index
    %c0_1 = arith.constant 0 : index
    %0 = vector.load %arg3[%c0, %c0_0, %c0_1] : memref<1x64x32xf32, #tpu.memory_space<vmem>>, vector<1x64x32xf32>
    %1 = vector.shape_cast %0 : vector<1x64x32xf32> to vector<64x32xf32>
    %c0_2 = arith.constant 0 : index
    %c0_3 = arith.constant 0 : index
    %c0_4 = arith.constant 0 : index
    %2 = vector.load %arg4[%c0_2, %c0_3, %c0_4] : memref<1x32x128xf32, #tpu.memory_space<vmem>>, vector<1x32x128xf32>
    %3 = vector.shape_cast %2 : vector<1x32x128xf32> to vector<32x128xf32>
    %cst = arith.constant dense<0.000000e+00> : vector<64x128xf32>
    %4 = tpu.matmul %1, %3, %cst {dimension_numbers = #tpu.dot_dimension_numbers<[1], [0], [0], [1], [0, 0, 1, 1], [], []>} : vector<64x32xf32>, vector<32x128xf32>, vector<64x128xf32> -> vector<64x128xf32>
    %c0_5 = arith.constant 0 : index
    %c0_6 = arith.constant 0 : index
    %5 = vector.load %arg5[%c0_5, %c0_6] : memref<128x4xf32, #tpu.memory_space<vmem>>, vector<128x4xf32>
    %c0_7 = arith.constant 0 : index
    %c0_8 = arith.constant 0 : index
    %6 = vector.load %arg6[%c0_7, %c0_8] : memref<4x128xf32, #tpu.memory_space<vmem>>, vector<4x128xf32>
    %cst_9 = arith.constant dense<0.000000e+00> : vector<64x4xf32>
    %7 = tpu.matmul %4, %5, %cst_9 {dimension_numbers = #tpu.dot_dimension_numbers<[1], [0], [0], [1], [0, 0, 1, 1], [], []>} : vector<64x128xf32>, vector<128x4xf32>, vector<64x4xf32> -> vector<64x4xf32>
    %cst_10 = arith.constant 3.125000e-02 : f32
    %8 = vector.broadcast %cst_10 : f32 to vector<64x4xf32>
    %9 = arith.mulf %7, %8 : vector<64x4xf32>
    %cst_11 = arith.constant dense<0.000000e+00> : vector<64x128xf32>
    %10 = tpu.matmul %9, %6, %cst_11 {dimension_numbers = #tpu.dot_dimension_numbers<[1], [0], [0], [1], [0, 0, 1, 1], [], []>} : vector<64x4xf32>, vector<4x128xf32>, vector<64x128xf32> -> vector<64x128xf32>
    %11 = arith.subf %4, %10 : vector<64x128xf32>
    %12 = arith.mulf %11, %11 : vector<64x128xf32>
    %cst_12 = arith.constant dense<0.000000e+00> : vector<64x4xf32>
    %13 = tpu.matmul %12, %5, %cst_12 {dimension_numbers = #tpu.dot_dimension_numbers<[1], [0], [0], [1], [0, 0, 1, 1], [], []>} : vector<64x128xf32>, vector<128x4xf32>, vector<64x4xf32> -> vector<64x4xf32>
    %cst_13 = arith.constant 3.125000e-02 : f32
    %14 = vector.broadcast %cst_13 : f32 to vector<64x4xf32>
    %15 = arith.mulf %13, %14 : vector<64x4xf32>
    %cst_14 = arith.constant 9.99999974E-6 : f32
    %16 = vector.broadcast %cst_14 : f32 to vector<64x4xf32>
    %17 = arith.addf %15, %16 : vector<64x4xf32>
    %18 = math.rsqrt %17 : vector<64x4xf32>
    %cst_15 = arith.constant dense<0.000000e+00> : vector<64x128xf32>
    %19 = tpu.matmul %18, %6, %cst_15 {dimension_numbers = #tpu.dot_dimension_numbers<[1], [0], [0], [1], [0, 0, 1, 1], [], []>} : vector<64x4xf32>, vector<4x128xf32>, vector<64x128xf32> -> vector<64x128xf32>
    %20 = arith.mulf %11, %19 : vector<64x128xf32>
    %c0_16 = arith.constant 0 : index
    %c0_17 = arith.constant 0 : index
    %21 = vector.load %arg7[%c0_16, %c0_17] : memref<1x128xf32, #tpu.memory_space<vmem>>, vector<1x128xf32>
    %22 = vector.broadcast %21 : vector<1x128xf32> to vector<64x128xf32>
    %23 = arith.mulf %20, %22 : vector<64x128xf32>
    %c0_18 = arith.constant 0 : index
    %c0_19 = arith.constant 0 : index
    %24 = vector.load %arg8[%c0_18, %c0_19] : memref<1x128xf32, #tpu.memory_space<vmem>>, vector<1x128xf32>
    %25 = vector.broadcast %24 : vector<1x128xf32> to vector<64x128xf32>
    %26 = arith.addf %23, %25 : vector<64x128xf32>
    %27 = vector.shape_cast %26 : vector<64x128xf32> to vector<1x8x1x8x128xf32>
    %c0_20 = arith.constant 0 : index
    %c0_21 = arith.constant 0 : index
    %c0_22 = arith.constant 0 : index
    %c0_23 = arith.constant 0 : index
    %c0_24 = arith.constant 0 : index
    %28 = vector.load %arg9[%c0_20, %c0_21, %c0_22, %c0_23, %c0_24] : memref<1x8x1x8x128xf32, #tpu.memory_space<vmem>>, vector<1x8x1x8x128xf32>
    tpu.vector_store %arg9[%c0_20, %c0_21, %c0_22, %c0_23, %c0_24], %27 {strides = array<i32>} : memref<1x8x1x8x128xf32, #tpu.memory_space<vmem>>, vector<1x8x1x8x128xf32>,
    return
  }
  func.func @transform_0(%arg0: i32, %arg1: i32, %arg2: i32) -> (i32, i32, i32) {
    %c0_i32 = arith.constant 0 : i32
    %c0_i32_0 = arith.constant 0 : i32
    return %arg0, %arg2, %c0_i32 : i32, i32, i32
  }
  func.func @transform_1(%arg0: i32, %arg1: i32, %arg2: i32) -> (i32, i32, i32) {
    %c0_i32 = arith.constant 0 : i32
    %c0_i32_0 = arith.constant 0 : i32
    %c0_i32_1 = arith.constant 0 : i32
    return %arg1, %c0_i32, %c0_i32_0 : i32, i32, i32
  }
  func.func @transform_2(%arg0: i32, %arg1: i32, %arg2: i32) -> (i32, i32) {
    %c0_i32 = arith.constant 0 : i32
    %c0_i32_0 = arith.constant 0 : i32
    %c0_i32_1 = arith.constant 0 : i32
    return %c0_i32, %c0_i32_0 : i32, i32
  }
  func.func @transform_3(%arg0: i32, %arg1: i32, %arg2: i32) -> (i32, i32) {
    %c0_i32 = arith.constant 0 : i32
    %c0_i32_0 = arith.constant 0 : i32
    %c0_i32_1 = arith.constant 0 : i32
    return %c0_i32, %c0_i32_0 : i32, i32
  }
  func.func @transform_4(%arg0: i32, %arg1: i32, %arg2: i32) -> (i32, i32) {
    %c0_i32 = arith.constant 0 : i32
    %c0_i32_0 = arith.constant 0 : i32
    %c0_i32_1 = arith.constant 0 : i32
    return %c0_i32, %c0_i32_0 : i32, i32
  }
  func.func @transform_5(%arg0: i32, %arg1: i32, %arg2: i32) -> (i32, i32) {
    %c0_i32 = arith.constant 0 : i32
    %c0_i32_0 = arith.constant 0 : i32
    %c0_i32_1 = arith.constant 0 : i32
    return %c0_i32, %c0_i32_0 : i32, i32
  }
  func.func @transform_6(%arg0: i32, %arg1: i32, %arg2: i32) -> (i32, i32, i32, i32, i32) {
    %c0_i32 = arith.constant 0 : i32
    %c0_i32_0 = arith.constant 0 : i32
    %c0_i32_1 = arith.constant 0 : i32
    return %arg0, %arg2, %arg1, %c0_i32, %c0_i32_0 : i32, i32, i32, i32, i32
  }
}

</mosaic_0001>

<bundles_post_ra>
// kernel: tpu_custom_call.1
= control target key start
LH: loop header
LB: loop body
LE: loop exit
PB: predicated region body
PF: predicated region fallthrough
CT: control target
= control target key end

     0   :  { %11 = vsyncpa [#allocation3], 0  ;;  %s1441_s0 = inlined_call_operand.vmem [shape: f32[2,64,32], index: 0, kind: input, shape index: {}]   ;;  %s1442_s1 = inlined_call_operand.vmem [shape: f32[4,32,128], index: 1, kind: input, shape index: {}]   ;;  %s1443_s2 = inlined_call_operand.vmem [shape: f32[128,4], index: 2, kind: input, shape index: {}]   ;;  %s1444_s3 = inlined_call_operand.vmem [shape: f32[4,128], index: 3, kind: input, shape index: {}]   ;;  %s1445_s4 = inlined_call_operand.vmem [shape: f32[1,128], index: 4, kind: input, shape index: {}]   ;;  %s1446_s5 = inlined_call_operand.vmem [shape: f32[1,128], index: 5, kind: input, shape index: {}]   ;;  %s1447_s6 = inlined_call_operand.hbm [shape: f32[2,8,4,8,128], index: 6, kind: output, shape index: {}]  }
   0x1   :  { %13 = vsyncpa [#allocation3 + $0x1], 0  ;;  %s1170_s21 = smov 0   ;;  %s1172_s22 = smov 0  }
   0x2   :  { %s1174_s23 = smov 0   ;;  %s1176_s24 = smov 0  }
   0x3   :  { %s1178_s25 = smov 0   ;;  %s1180_s26 = smov 0  }
   0x4   :  { %s1182_s27 = smov 0   ;;  %s1184_s28 = smov 0  }
   0x5 LB: > { %s900_s29 = sadd.s32 4294967295, %s1130_s28   ;;  %s901_s30 = sadd.s32 4294967294, %s1130_s28   ;;  %s1130_s28 = sphi %s1184_s28, %s19_s28   ;;  %s1126_s27 = sphi %s1182_s27, %s1456_s27   ;;  %s1122_s26 = sphi %s1180_s26, %s1455_s26   ;;  %s1118_s25 = sphi %s1178_s25, %s1454_s25   ;;  %s1114_s24 = sphi %s1176_s24, %s1453_s24   ;;  %s1110_s23 = sphi %s1174_s23, %s1452_s23   ;;  %s1106_s22 = sphi %s1172_s22, %s1451_s22   ;;  %s1102_s21 = sphi %s1170_s21, %s1450_s21  }
   0x6   : > { %s34_s7 = sadd.s32 1, %s1122_s26  ;;  %s38_s8 = sadd.s32 1, %s1126_s27 }
   0x7   : > { %p36_p0 = scmp.ge.s32.totalorder %s34_s7, 4  ;;  %p197_p1 = scmp.ne.s32.totalorder %s1110_s23, %s1106_s22 }
   0x8   : > { %p198_p2 = scmp.eq.s32.totalorder %s900_s29, 7  ;;  %p203_p5 = scmp.ne.s32.totalorder %s1106_s22, %s1102_s21 }
   0x9   : > { %s1458_s7 = smov (%p36_p0, %s34_s7), 0  ;;  %s1460_s8 = smov (!%p36_p0, %s38_s8), %s1126_s27 }
   0xa   : > { %s183_s9 = ssub.s32 %s1122_s26, %s1458_s7  ;;  %p1221_p3 = por %p198_p2, %p197_p1 }
   0xb   : > { %p40_p4 = scmp.ge.s32.totalorder %s1460_s8, 2  ;;  %p204_p6 = scmp.eq.s32.totalorder %s901_s30, 7 }
   0xc   : > { %p904_p7 = scmp.ge.s32.totalorder %s1130_s28, 1  ;;  %p255_p9 = scmp.lt.s32.totalorder %s1130_s28, 9 }
   0xd   : > { %s1462_s8 = smov (%p40_p4, %s1460_s8), 0  ;;  %p1230_p8 = por %p204_p6, %p203_p5 }
   0xe   : > { %s180_s12 = ssub.s32 %s1126_s27, %s1462_s8  ;;  %s187_s13 = sadd.s32 1, %s1110_s23 }
   0xf   : > { %s184_s14 = sor.u32 %s183_s9, %s180_s12  ;;  %p256_p10 = pnand %p904_p7, %p255_p9 }
  0x10   : > { %p185_p11 = scmp.eq.s32.totalorder %s184_s14, 0  ;;  %p304_p12 = scmp.lt.s32.totalorder (!%p256_p10), %s1114_s24, 3 }
  0x11   : > { %259 = sbr.rel (%p256_p10) target bundleno = 777 (0x309), region = 44  ;;  %p295_p13 = scmp.lt.s32.totalorder (!%p256_p10), %s1118_s25, 1 }
  0x12   : > { %s1239_s15 = scalar_select %p185_p11, %s1110_s23, %s187_s13  }
  0x13   : > { %s937_s14 = sshll.u32 (!%p256_p10), %s1118_s25, 5 }
  0x16   : > { %s305_s16 = scalar_select %p304_p12, %s1114_s24, 3  ;;  %vm322_vm0 = vcmask 261120   ;;  %v403_v8 = vld [vmem:[%s1443_s2 + $0x78] sm:$0xff]  ;;  %v402_v9 = vld [vmem:[%s1443_s2 + $0x70] sm:$0xff]  ;;  %v401_v10 = vld [vmem:[%s1443_s2 + $0x68] sm:$0xff]  ;;  %vm479_vm1 = vcmask 1043456  }
  0x17   : > { %s296_s17 = scalar_select %p295_p13, %s1118_s25, 1  ;;  %405 = vmatpush.msra.mxu1 %v403_v8  ;;  %540 = vmatpush.msra.mxu3 %v403_v8  ;;  %v400_v11 = vld [vmem:[%s1443_s2 + $0x60] sm:$0xff]  ;;  %v399_v13 = vld [vmem:[%s1443_s2 + $0x58] sm:$0xff]  ;;  %v398_v14 = vld [vmem:[%s1443_s2 + $0x50] sm:$0xff]  ;;  %vm454_vm2 = vcmask 31744  }
  0x18   : > { %s942_s18 = sshll.u32 %s305_s16, 5  ;;  %v397_v15 = vld [vmem:[%s1443_s2 + $0x48] sm:$0xff]  ;;  %v396_v16 = vld [vmem:[%s1443_s2 + $0x40] sm:$0xff]  ;;  %v395_v18 = vld [vmem:[%s1443_s2 + $0x38] sm:$0xff]  ;;  %s796_s16 = sadd.s32 %s1114_s24, %s937_s14 }
  0x19   : > { %s308_s29 = scalar_lea.vmem %s1442_s1, %s942_s18  ;;  %s941_s30 = sshll.u32 %s296_s17, 6  ;;  %406 = vmatpush.msra.mxu1 %v402_v9  ;;  %541 = vmatpush.msra.mxu3 %v402_v9  ;;  %v394_v19 = vld [vmem:[%s1443_s2 + $0x30] sm:$0xff]  ;;  %v393_v20 = vld [vmem:[%s1443_s2 + $0x28] sm:$0xff]  ;;  %v392_v21 = vld [vmem:[%s1443_s2 + $0x20] sm:$0xff] }
  0x1a   : > { %v321_v0 = vld [vmem:[%s308_s29 + $0x18] sm:$0xff]  ;;  %v320_v1 = vld [vmem:[%s308_s29 + $0x10] sm:$0xff]  ;;  %v319_v2 = vld [vmem:[%s308_s29 + $0x8] sm:$0xff]  ;;  %s1251_s13 = scalar_lea.vmem %s1441_s0, %s941_s30  ;;  %s291_s18 = sand.u32 1, %s1106_s22  }
  0x1b   : > { %359 = vmatpush.msra.mxu0 %v321_v0  ;;  %v318_v3 = vld [vmem:[%s308_s29] sm:$0xff]  ;;  %v311_v5 = vld [vmem:[%s1251_s13 + $0x8] sm:$0xff]  ;;  %v312_v6 = vld [vmem:[%s1251_s13 + $0x10] sm:$0xff]  ;;  %407 = vmatpush.msra.mxu1 %v401_v10  ;;  %s905_s29 = sshll.u32 %s291_s18, 6  ;;  %s938_s17 = sshll.u32 %s796_s16, 3 }
  0x1c   : > { %v310_v4 = vld [vmem:[%s1251_s13] sm:$0xff]  ;;  %v313_v7 = vld [vmem:[%s1251_s13 + $0x18] sm:$0xff]  ;;  %542 = vmatpush.msra.mxu3 %v401_v10  ;;  %v315_v17 = vld [vmem:[%s1251_s13 + $0x28] sm:$0xff]  ;;  %s1378_s12 = scalar_lea.vmem [#allocation2], %s905_s29  ;;  %s798_s20 = scalar_lea.hbm %s1447_s6, %s938_s17 }
  0x1d   : > { %360 = vmatpush.msra.mxu0 %v320_v1  ;;  %v314_v12 = vld [vmem:[%s1251_s13 + $0x20] sm:$0xff]  ;;  %408 = vmatpush.msra.mxu1 %v400_v11  ;;  %v316_v22 = vld [vmem:[%s1251_s13 + $0x30] sm:$0xff]  ;;  %v391_v23 = vld [vmem:[%s1443_s2 + $0x18] sm:$0xff]  ;;  %s799_s29 = sshll.u32 %s1378_s12, 4  ;;  %s801_s25 = sshll.u32 %s798_s20, 4  ;;  %s800_s29 = int_to_ptr.vmem [resolvable:$true] %s799_s29  ;;  %s802_s25 = int_to_ptr.hbm [resolvable:$true] %s801_s25 }
  0x1e   : > { %543 = vmatpush.msra.mxu3 %v400_v11  ;;  %v390_v24 = vld [vmem:[%s1443_s2 + $0x10] sm:$0xff]  ;;  %v389_v25 = vld [vmem:[%s1443_s2 + $0x8] sm:$0xff]  ;;  %v317_v26 = vld [vmem:[%s1251_s13 + $0x38] sm:$0xff]  ;;  %s783_s24 = scalar_lea.sflag [#allocation3], %s291_s18  ;;  %s1050_s30 = sshra.s32 %s802_s25, 4  ;;  %s1051_s30 = int_to_ptr.hbm [resolvable:$true] %s1050_s30 }
  0x1f   : > { %361 = vmatpush.msra.mxu0 %v319_v2  ;;  %409 = vmatpush.msra.mxu1 %v399_v13  ;;  %v388_v27 = vld [vmem:[%s1443_s2] sm:$0xff]  ;;  %s1052_s9 = scalar_lea.hbm %s1051_s30, 64  ;;  %s1056_s17 = scalar_lea.hbm %s1447_s6, 512 }
  0x20   : > { %544 = vmatpush.msra.mxu3 %v399_v13  ;;  %v404_v32 = vld [vmem:[%s1444_s3] sm:$0xf]  ;;  %p1053_p0 = scmp.ne.s32.totalorder %s1051_s30, %s1052_s9  ;;  %p1057_p4 = scmp.lt.s32.totalorder %s1051_s30, %s1447_s6 }
  0x21   : > { %362 = vmatpush.msra.mxu0 %v318_v3  ;;  %410 = vmatpush.msra.mxu1 %v398_v14  ;;  %p1058_p5 = scmp.lt.s32.totalorder %s1056_s17, %s1052_s9 }
  0x22   : > { %910 = vmatmul.msk.f32.vlgmr.msra.gmra.mxu0 %vm322_vm0, %v310_v4  ;;  %545 = vmatpush.msra.mxu3 %v398_v14  ;;  %p1054_p1 = pnand %p1053_p0, %p1221_p3 }
  0x23   : > { %411 = vmatpush.msra.mxu1 %v397_v15  ;;  %918 = vmatpush.msk.msrb.mxu0 %vm479_vm1, %v404_v32  ;;  %p1059_p6 = por %p1058_p5, %p1057_p4 }
  0x24   : > { %546 = vmatpush.msra.mxu3 %v397_v15  ;;  %943 = vmatpush.msk.msra.mxu2 %vm479_vm1, %v404_v32  ;;  %p1055_p2 = pneg %p1054_p1 }
  0x25   : > { %412 = vmatpush.msra.mxu1 %v396_v16 }
  0x26   : > { %547 = vmatpush.msra.mxu3 %v396_v16  ;;  %927 = vmatpush.msk.msrb.mxu2 %vm479_vm1, %v404_v32  ;;  %p1060_p7 = pnand %p1059_p6, %p1055_p2 }
  0x27   : > { %413 = vmatpush.msra.mxu1 %v395_v18 }
  0x28   : > { %548 = vmatpush.msra.mxu3 %v395_v18 }
  0x29   : > { %414 = vmatpush.msra.mxu1 %v394_v19 }
  0x2a   : > { %911 = vmatmul.msk.f32.gmra.mxu0 %vm322_vm0, %v311_v5  ;;  %549 = vmatpush.msra.mxu3 %v394_v19 }
  0x2b   : > { %415 = vmatpush.msra.mxu1 %v393_v20 }
  0x2c   : > { %550 = vmatpush.msra.mxu3 %v393_v20 }
  0x2d   : > { %416 = vmatpush.msra.mxu1 %v392_v21 }
  0x2e   : > { %551 = vmatpush.msra.mxu3 %v392_v21 }
  0x2f   : > { %417 = vmatpush.msra.mxu1 %v391_v23 }
  0x30   : > { %552 = vmatpush.msra.mxu3 %v391_v23 }
  0x31   : > { %418 = vmatpush.msra.mxu1 %v390_v24 }
  0x32   : > { %912 = vmatmul.msk.f32.gmra.mxu0 %vm322_vm0, %v312_v6  ;;  %553 = vmatpush.msra.mxu3 %v390_v24 }
  0x33   : > { %419 = vmatpush.msra.mxu1 %v389_v25 }
  0x34   : > { %554 = vmatpush.msra.mxu3 %v389_v25 }
  0x35   : > { %420 = vmatpush.msra.mxu1 %v388_v27 }
  0x36   : > { %555 = vmatpush.msra.mxu3 %v388_v27 }
  0x3a   : > { %913 = vmatmul.msk.f32.gmra.mxu0 %vm322_vm0, %v313_v7 }
  0x42   : > { %914 = vmatmul.msk.f32.gmra.mxu0 %vm322_vm0, %v314_v12 }
  0x4a   : > { %915 = vmatmul.msk.f32.gmra.mxu0 %vm322_vm0, %v315_v17 }
  0x52   : > { %916 = vmatmul.msk.f32.gmra.mxu0 %vm322_vm0, %v316_v22 }
  0x5a   : > { %917 = vmatmul.msk.f32.gmra.mxu0 %vm322_vm0, %v317_v26 }
  0x9f   : > { %v364_v28 = vpop.f32.mrf.mxu0 }
  0xa0   : > { %421 = vmatmul.f32.vlgmr.msra.gmra.mxu1 %v364_v28 }
  0xa7   : > { %v367_v29 = vpop.f32.mrf.mxu0 }
  0xa8   : > { %424 = vmatmul.f32.gmra.mxu1 %v367_v29 }
  0xaf   : > { %v370_v30 = vpop.f32.mrf.mxu0 }
  0xb0   : > { %427 = vmatmul.f32.gmra.mxu1 %v370_v30 }
  0xb7   : > { %v373_v31 = vpop.f32.mrf.mxu0 }
  0xb8   : > { %430 = vmatmul.f32.gmra.mxu1 %v373_v31 }
  0xbf   : > { %v376_v33 = vpop.f32.mrf.mxu0 }
  0xc0   : > { %433 = vmatmul.f32.gmra.mxu1 %v376_v33 }
  0xc7   : > { %v379_v34 = vpop.f32.mrf.mxu0 }
  0xc8   : > { %436 = vmatmul.f32.gmra.mxu1 %v379_v34 }
  0xcf   : > { %v382_v35 = vpop.f32.mrf.mxu0 }
  0xd0   : > { %439 = vmatmul.f32.gmra.mxu1 %v382_v35 }
  0xd7   : > { %v385_v36 = vpop.f32.mrf.mxu0 }
  0xd8   : > { %442 = vmatmul.f32.gmra.mxu1 %v385_v36 }
 0x11d   : > { %v422_v37 = vpop.f32.mrf.mxu1 }
 0x11e   : > { %v446_v38 = vmul.f32 0.03125, %v422_v37 }
 0x120   : > { %919 = vmatmul.msk.f32.vlgmr.msrb.gmra.mxu0 %vm454_vm2, %v446_v38 }
 0x125   : > { %v425_v39 = vpop.f32.mrf.mxu1 }
 0x126   : > { %v447_v40 = vmul.f32 0.03125, %v425_v39 }
 0x128   : > { %920 = vmatmul.msk.f32.gmra.mxu0 %vm454_vm2, %v447_v40 }
 0x12d   : > { %v428_v41 = vpop.f32.mrf.mxu1 }
 0x12e   : > { %v448_v42 = vmul.f32 0.03125, %v428_v41 }
 0x130   : > { %921 = vmatmul.msk.f32.gmra.mxu0 %vm454_vm2, %v448_v42 }
 0x135   : > { %v431_v43 = vpop.f32.mrf.mxu1 }
 0x136   : > { %v449_v44 = vmul.f32 0.03125, %v431_v43 }
 0x138   : > { %922 = vmatmul.msk.f32.gmra.mxu0 %vm454_vm2, %v449_v44 }
 0x13d   : > { %v434_v45 = vpop.f32.mrf.mxu1 }
 0x13e   : > { %v450_v46 = vmul.f32 0.03125, %v434_v45 }
 0x140   : > { %923 = vmatmul.msk.f32.vlgmr.msra.gmra.mxu2 %vm454_vm2, %v450_v46 }
 0x145   : > { %v437_v47 = vpop.f32.mrf.mxu1 }
 0x146   : > { %v451_v48 = vmul.f32 0.03125, %v437_v47 }
 0x148   : > { %924 = vmatmul.msk.f32.gmra.mxu2 %vm454_vm2, %v451_v48 }
 0x14d   : > { %v440_v49 = vpop.f32.mrf.mxu1 }
 0x14e   : > { %v452_v50 = vmul.f32 0.03125, %v440_v49 }
 0x150   : > { %925 = vmatmul.msk.f32.gmra.mxu2 %vm454_vm2, %v452_v50 }
 0x155   : > { %v443_v51 = vpop.f32.mrf.mxu1 }
 0x156   : > { %v453_v52 = vmul.f32 0.03125, %v443_v51 }
 0x158   : > { %926 = vmatmul.msk.f32.gmra.mxu2 %vm454_vm2, %v453_v52 }
 0x19d   : > { %v500_v53 = vpop.f32.mrf.mxu0 }
 0x19e   : > { %v1328_v54 = vsub.f32 %v364_v28, %v500_v53 }
 0x1a0   : > { %v532_v55 = vmul.f32 %v1328_v54, %v1328_v54 }
 0x1a2   : > { %556 = vmatmul.f32.vlgmr.msra.gmra.mxu3 %v532_v55 }
 0x1a5   : > { %v503_v56 = vpop.f32.mrf.mxu0 }
 0x1a6   : > { %v1332_v57 = vsub.f32 %v367_v29, %v503_v56 }
 0x1a8   : > { %v533_v58 = vmul.f32 %v1332_v57, %v1332_v57 }
 0x1aa   : > { %559 = vmatmul.f32.gmra.mxu3 %v533_v58 }
 0x1ad   : > { %v506_v59 = vpop.f32.mrf.mxu0 }
 0x1ae   : > { %v1336_v60 = vsub.f32 %v370_v30, %v506_v59 }
 0x1b0   : > { %v534_v61 = vmul.f32 %v1336_v60, %v1336_v60 }
 0x1b2   : > { %562 = vmatmul.f32.gmra.mxu3 %v534_v61 }
 0x1b5   : > { %v509_v62 = vpop.f32.mrf.mxu0 }
 0x1b6   : > { %v1340_v63 = vsub.f32 %v373_v31, %v509_v62 }
 0x1b8   : > { %v535_v0 = vmul.f32 %v1340_v63, %v1340_v63 }
 0x1ba   : > { %565 = vmatmul.f32.gmra.mxu3 %v535_v0 }
 0x1c3   : > { %v512_v1 = vpop.f32.mrf.mxu2 }
 0x1c4   : > { %v1344_v2 = vsub.f32 %v376_v33, %v512_v1 }
 0x1c6   : > { %v536_v3 = vmul.f32 %v1344_v2, %v1344_v2 }
 0x1c8   : > { %568 = vmatmul.f32.gmra.mxu3 %v536_v3 }
 0x1cb   : > { %v515_v4 = vpop.f32.mrf.mxu2 }
 0x1cc   : > { %v1348_v5 = vsub.f32 %v379_v34, %v515_v4 }
 0x1ce   : > { %v537_v6 = vmul.f32 %v1348_v5, %v1348_v5 }
 0x1d0   : > { %571 = vmatmul.f32.gmra.mxu3 %v537_v6 }
 0x1d3   : > { %v518_v7 = vpop.f32.mrf.mxu2 }
 0x1d4   : > { %v1352_v8 = vsub.f32 %v382_v35, %v518_v7 }
 0x1d6   : > { %v538_v9 = vmul.f32 %v1352_v8, %v1352_v8 }
 0x1d8   : > { %574 = vmatmul.f32.gmra.mxu3 %v538_v9 }
 0x1db   : > { %v521_v10 = vpop.f32.mrf.mxu2 }
 0x1dc   : > { %v1356_v11 = vsub.f32 %v385_v36, %v521_v10 }
 0x1de   : > { %v539_v12 = vmul.f32 %v1356_v11, %v1356_v11 }
 0x1e0   : > { %577 = vmatmul.f32.gmra.mxu3 %v539_v12 }
 0x225   : > { %v557_v13 = vpop.f32.mrf.mxu3 }
 0x226   : > { %v581_v14 = vmul.f32 0.03125, %v557_v13 }
 0x228   : > { %v589_v15 = vadd.f32 1e-05, %v581_v14 }
 0x22a   : > { %1020 = vrsqrt.f32 %v589_v15  ;;  %vm603_vm4 = vweird.f32 %v589_v15 }
 0x22d   : > { %v560_v16 = vpop.f32.mrf.mxu3 }
 0x22e   : > { %v582_v17 = vmul.f32 0.03125, %v560_v16 }
 0x230   : > { %v1021_v18 = vpop.eup %1020  ;;  %v590_v19 = vadd.f32 1e-05, %v582_v17 }
 0x231   : > { %v598_v20 = vmul.f32 %v1021_v18, %v589_v15  ;;  %vm604_vm3 = vweird.f32 %v1021_v18 }
 0x232   : > { %1022 = vrsqrt.f32 %v590_v19  ;;  %vm605_vm5 = vmor %vm603_vm4, %vm604_vm3  ;;  %vm613_vm7 = vweird.f32 %v590_v19 }
 0x233   : > { %v599_v21 = vmul.f32 %v1021_v18, %v598_v20 }
 0x235   : > { %v600_v22 = vmul.f32 0.5, %v599_v21  ;;  %v563_v23 = vpop.f32.mrf.mxu3 }
 0x236   : > { %v583_v24 = vmul.f32 0.03125, %v563_v23 }
 0x237   : > { %v601_v25 = vsub.f32 1.5, %v600_v22 }
 0x238   : > { %v1023_v26 = vpop.eup %1022  ;;  %v591_v27 = vadd.f32 1e-05, %v583_v24 }
 0x239   : > { %v608_v28 = vmul.f32 %v1023_v26, %v590_v19  ;;  %v602_v29 = vmul.f32 %v1021_v18, %v601_v25  ;;  %vm614_vm6 = vweird.f32 %v1023_v26 }
 0x23a   : > { %1024 = vrsqrt.f32 %v591_v27  ;;  %vm615_vm8 = vmor %vm613_vm7, %vm614_vm6  ;;  %vm623_vm10 = vweird.f32 %v591_v27 }
 0x23b   : > { %v609_v30 = vmul.f32 %v1023_v26, %v608_v28  ;;  %v606_v31 = vsel %vm605_vm5, %v1021_v18, %v602_v29 }
 0x23c   : > { %928 = vmatmul.msk.f32.vlgmr.msrb.gmra.mxu2 %vm454_vm2, %v606_v31 }
 0x23d   : > { %v610_v32 = vmul.f32 0.5, %v609_v30  ;;  %v566_v33 = vpop.f32.mrf.mxu3 }
 0x23e   : > { %v584_v34 = vmul.f32 0.03125, %v566_v33 }
 0x23f   : > { %v611_v35 = vsub.f32 1.5, %v610_v32 }
 0x240   : > { %v1025_v36 = vpop.eup %1024  ;;  %v592_v37 = vadd.f32 1e-05, %v584_v34 }
 0x241   : > { %v618_v38 = vmul.f32 %v1025_v36, %v591_v27  ;;  %v612_v39 = vmul.f32 %v1023_v26, %v611_v35  ;;  %vm624_vm9 = vweird.f32 %v1025_v36 }
 0x242   : > { %1026 = vrsqrt.f32 %v592_v37  ;;  %vm625_vm11 = vmor %vm623_vm10, %vm624_vm9  ;;  %vm633_vm13 = vweird.f32 %v592_v37 }
 0x243   : > { %v619_v40 = vmul.f32 %v1025_v36, %v618_v38  ;;  %v616_v41 = vsel %vm615_vm8, %v1023_v26, %v612_v39 }
 0x244   : > { %929 = vmatmul.msk.f32.gmra.mxu2 %vm454_vm2, %v616_v41 }
 0x245   : > { %v620_v42 = vmul.f32 0.5, %v619_v40  ;;  %v1019_v40 = vld [vmem:[%s1446_s5] ss:$0 sm:$0xff] }
 0x247   : > { %v621_v43 = vsub.f32 1.5, %v620_v42 }
 0x248   : > { %v1027_v44 = vpop.eup %1026 }
 0x249   : > { %v628_v45 = vmul.f32 %v1027_v44, %v592_v37  ;;  %v622_v46 = vmul.f32 %v1025_v36, %v621_v43  ;;  %vm634_vm12 = vweird.f32 %v1027_v44  ;;  %v1018_v37 = vld [vmem:[%s1445_s4] ss:$0 sm:$0xff] }
 0x24a   : > { %vm635_vm14 = vmor %vm633_vm13, %vm634_vm12 }
 0x24b   : > { %v629_v47 = vmul.f32 %v1027_v44, %v628_v45  ;;  %v569_v48 = vpop.f32.mrf.mxu3  ;;  %v626_v49 = vsel %vm625_vm11, %v1025_v36, %v622_v46 }
 0x24c   : > { %v585_v50 = vmul.f32 0.03125, %v569_v48  ;;  %930 = vmatmul.msk.f32.gmra.mxu2 %vm454_vm2, %v626_v49 }
 0x24d   : > { %v630_v51 = vmul.f32 0.5, %v629_v47 }
 0x24e   : > { %v593_v52 = vadd.f32 1e-05, %v585_v50 }
 0x24f   : > { %v631_v53 = vsub.f32 1.5, %v630_v51 }
 0x250   : > { %1028 = vrsqrt.f32 %v593_v52  ;;  %vm643_vm0 = vweird.f32 %v593_v52 }
 0x251   : > { %v632_v55 = vmul.f32 %v1027_v44, %v631_v53 }
 0x253   : > { %v572_v56 = vpop.f32.mrf.mxu3  ;;  %v636_v58 = vsel %vm635_vm14, %v1027_v44, %v632_v55 }
 0x254   : > { %v586_v59 = vmul.f32 0.03125, %v572_v56  ;;  %931 = vmatmul.msk.f32.gmra.mxu2 %vm454_vm2, %v636_v58 }
 0x256   : > { %v1029_v61 = vpop.eup %1028  ;;  %v594_v62 = vadd.f32 1e-05, %v586_v59 }
 0x257   : > { %v638_v0 = vmul.f32 %v1029_v61, %v593_v52  ;;  %vm644_vm15 = vweird.f32 %v1029_v61 }
 0x258   : > { %1030 = vrsqrt.f32 %v594_v62  ;;  %vm645_vm1 = vmor %vm643_vm0, %vm644_vm15  ;;  %vm653_vm4 = vweird.f32 %v594_v62 }
 0x259   : > { %v639_v1 = vmul.f32 %v1029_v61, %v638_v0 }
 0x25b   : > { %v640_v3 = vmul.f32 0.5, %v639_v1  ;;  %v575_v4 = vpop.f32.mrf.mxu3 }
 0x25c   : > { %v587_v6 = vmul.f32 0.03125, %v575_v4 }
 0x25d   : > { %v641_v7 = vsub.f32 1.5, %v640_v3 }
 0x25e   : > { %v1031_v9 = vpop.eup %1030  ;;  %v595_v10 = vadd.f32 1e-05, %v587_v6 }
 0x25f   : > { %v648_v12 = vmul.f32 %v1031_v9, %v594_v62  ;;  %v642_v13 = vmul.f32 %v1029_v61, %v641_v7  ;;  %vm654_vm3 = vweird.f32 %v1031_v9 }
 0x260   : > { %1032 = vrsqrt.f32 %v595_v10  ;;  %vm655_vm5 = vmor %vm653_vm4, %vm654_vm3  ;;  %vm663_vm7 = vweird.f32 %v595_v10 }
 0x261   : > { %v649_v14 = vmul.f32 %v1031_v9, %v648_v12  ;;  %v646_v15 = vsel %vm645_vm1, %v1029_v61, %v642_v13 }
 0x262   : > { %932 = vmatmul.msk.f32.gmra.mxu2 %vm454_vm2, %v646_v15 }
 0x263   : > { %v650_v16 = vmul.f32 0.5, %v649_v14  ;;  %v578_v17 = vpop.f32.mrf.mxu3 }
 0x264   : > { %v588_v18 = vmul.f32 0.03125, %v578_v17 }
 0x265   : > { %v651_v19 = vsub.f32 1.5, %v650_v16 }
 0x266   : > { %v1033_v20 = vpop.eup %1032  ;;  %v596_v21 = vadd.f32 1e-05, %v588_v18 }
 0x267   : > { %v658_v22 = vmul.f32 %v1033_v20, %v595_v10  ;;  %v652_v23 = vmul.f32 %v1031_v9, %v651_v19  ;;  %vm664_vm6 = vweird.f32 %v1033_v20 }
 0x268   : > { %1034 = vrsqrt.f32 %v596_v21  ;;  %vm665_vm8 = vmor %vm663_vm7, %vm664_vm6  ;;  %vm673_vm10 = vweird.f32 %v596_v21 }
 0x269   : > { %v659_v24 = vmul.f32 %v1033_v20, %v658_v22  ;;  %v656_v25 = vsel %vm655_vm5, %v1031_v9, %v652_v23 }
 0x26a   : > { %933 = vmatmul.msk.f32.gmra.mxu2 %vm454_vm2, %v656_v25 }
 0x26b   : > { %v660_v26 = vmul.f32 0.5, %v659_v24 }
 0x26d   : > { %v661_v27 = vsub.f32 1.5, %v660_v26 }
 0x26e   : > { %v1035_v28 = vpop.eup %1034 }
 0x26f   : > { %v668_v29 = vmul.f32 %v1035_v28, %v596_v21  ;;  %v662_v30 = vmul.f32 %v1033_v20, %v661_v27  ;;  %vm674_vm9 = vweird.f32 %v1035_v28 }
 0x270   : > { %vm675_vm11 = vmor %vm673_vm10, %vm674_vm9 }
 0x271   : > { %v669_v31 = vmul.f32 %v1035_v28, %v668_v29  ;;  %v666_v32 = vsel %vm665_vm8, %v1033_v20, %v662_v30 }
 0x272   : > { %934 = vmatmul.msk.f32.gmra.mxu2 %vm454_vm2, %v666_v32 }
 0x273   : > { %v670_v33 = vmul.f32 0.5, %v669_v31 }
 0x275   : > { %v671_v34 = vsub.f32 1.5, %v670_v33 }
 0x277   : > { %v672_v35 = vmul.f32 %v1035_v28, %v671_v34 }
 0x279   : > { %v676_v36 = vsel %vm675_vm11, %v1035_v28, %v672_v35 }
 0x27a   : > { %935 = vmatmul.msk.f32.gmra.mxu2 %vm454_vm2, %v676_v36 }
 0x2bf   : > { %v718_v38 = vpop.f32.mrf.mxu2 }
 0x2c0   : > { %v742_v39 = vmul.f32 %v718_v38, %v1328_v54 }
 0x2c2   : > { %v754_v41 = vmul.f32 %v1018_v37, %v742_v39 }
 0x2c4   : > { %v766_v42 = vadd.f32 %v1019_v40, %v754_v41 }
 0x2c6   : > { %774 = vst [vmem:[%s1378_s12] sm:$0xff] %v766_v42 }
 0x2c7   : > { %v721_v43 = vpop.f32.mrf.mxu2 }
 0x2c8   : > { %v743_v44 = vmul.f32 %v721_v43, %v1332_v57 }
 0x2ca   : > { %v755_v45 = vmul.f32 %v1018_v37, %v743_v44 }
 0x2cc   : > { %v767_v46 = vadd.f32 %v1019_v40, %v755_v45 }
 0x2ce   : > { %775 = vst [vmem:[%s1378_s12 + $0x8] sm:$0xff] %v767_v46 }
 0x2cf   : > { %v724_v54 = vpop.f32.mrf.mxu2 }
 0x2d0   : > { %v744_v47 = vmul.f32 %v724_v54, %v1336_v60 }
 0x2d2   : > { %v756_v48 = vmul.f32 %v1018_v37, %v744_v47 }
 0x2d4   : > { %v768_v49 = vadd.f32 %v1019_v40, %v756_v48 }
 0x2d6   : > { %776 = vst [vmem:[%s1378_s12 + $0x10] sm:$0xff] %v768_v49 }
 0x2d7   : > { %v727_v50 = vpop.f32.mrf.mxu2 }
 0x2d8   : > { %v745_v51 = vmul.f32 %v727_v50, %v1340_v63 }
 0x2da   : > { %v757_v52 = vmul.f32 %v1018_v37, %v745_v51 }
 0x2dc   : > { %v769_v53 = vadd.f32 %v1019_v40, %v757_v52 }
 0x2de   : > { %777 = vst [vmem:[%s1378_s12 + $0x18] sm:$0xff] %v769_v53 }
 0x2e5   : > { %v730_v57 = vpop.f32.mrf.mxu2 }
 0x2e6   : > { %v746_v55 = vmul.f32 %v730_v57, %v1344_v2 }
 0x2e8   : > { %v758_v56 = vmul.f32 %v1018_v37, %v746_v55 }
 0x2ea   : > { %v770_v58 = vadd.f32 %v1019_v40, %v758_v56 }
 0x2ec   : > { %778 = vst [vmem:[%s1378_s12 + $0x20] sm:$0xff] %v770_v58 }
 0x2ed   : > { %v733_v60 = vpop.f32.mrf.mxu2 }
 0x2ee   : > { %v747_v59 = vmul.f32 %v733_v60, %v1348_v5 }
 0x2f0   : > { %v759_v61 = vmul.f32 %v1018_v37, %v747_v59 }
 0x2f2   : > { %v771_v62 = vadd.f32 %v1019_v40, %v759_v61 }
 0x2f4   : > { %779 = vst [vmem:[%s1378_s12 + $0x28] sm:$0xff] %v771_v62 }
 0x2f5   : > { %v736_v63 = vpop.f32.mrf.mxu2 }
 0x2f6   : > { %v748_v0 = vmul.f32 %v736_v63, %v1352_v8 }
 0x2f8   : > { %v760_v1 = vmul.f32 %v1018_v37, %v748_v0 }
 0x2fa   : > { %v772_v2 = vadd.f32 %v1019_v40, %v760_v1 }
 0x2fc   : > { %780 = vst [vmem:[%s1378_s12 + $0x30] sm:$0xff] %v772_v2 }
 0x2fd   : > { %v739_v5 = vpop.f32.mrf.mxu2 }
 0x2fe   : > { %v749_v3 = vmul.f32 %v739_v5, %v1356_v11 }
 0x300   : > { %v761_v4 = vmul.f32 %v1018_v37, %v749_v3 }
 0x302   : > { %v773_v6 = vadd.f32 %v1019_v40, %v761_v4 }
 0x304   : > { %781 = vst [vmem:[%s1378_s12 + $0x38] sm:$0xff] %v773_v6 }
 0x305   : > { %1063 = shalt.err (!%p1060_p7)
}
 0x306   : > { %s1132_s18 = smov 128   ;;  %s1133_s12 = smov 512  }
 0x307   : > { %s1134_s20 = smov 8  }
 0x308   : > { %944 = dma.vmem_to_hbm [thread:$0]  (%p1221_p3), %s800_s29, 1024, %s802_s25, %s783_s24, %s1132_s18, %s1133_s12, %s1134_s20  }
 0x309 PF: > { %p950_p9 = scmp.ge.s32.totalorder %s1130_s28, 2  ;;  %s816_s14 = sand.u32 1, %s1102_s21  }
 0x30a   : > { %s817_s30 = scalar_lea.sflag [#allocation3], %s816_s14 }
 0x30b   : > { %p947_p10 = pnand %p950_p9, %p1230_p8 }
 0x30d   : > { %p948_p11 = pneg %p947_p10 }
 0x30f   : > { %1097 = dma.done.wait (%p948_p11), %s817_s30, 1024  }
 0x310   : > { %1099 = vsyncadd (%p948_p11), %s817_s30, 4294966272  ;;  %s19_s28 = sadd.s32 1, %s1130_s28   ;;  %s1450_s21 = smov %s1106_s22 }
 0x311   : > { %p16_p12 = scmp.ge.s32.totalorder %s19_s28, 10   ;;  %s1451_s22 = smov %s1110_s23 }
 0x312   : > { %s1452_s23 = smov %s1239_s15  ;;  %s1453_s24 = smov %s1122_s26 }
 0x313   : > { %s1454_s25 = smov %s1126_s27  ;;  %s1455_s26 = smov %s1458_s7 }
 0x314   : > { %s1456_s27 = smov %s1462_s8  ;;  %18 = sbr.rel (!%p16_p12) target bundleno = 5 (0x5), region = 82 }
 0x319   :  { %823 = vsyncpa [#allocation3], 1 }
 0x31a   :  { %825 = vsyncpa [#allocation3 + $0x1], 1 }

</bundles_post_ra>
